<compile_context>
chip_gen: v7x
topology: tpu7x:2x2x1
jax: 0.10.0
libtpu: 0.0.40
codegen_flags: <defaults>
</compile_context>

<pallas_src>
import jax
import jax.numpy as jnp
from jax.experimental import pallas as pl
from jax.experimental.pallas import tpu as pltpu


# --------------------------------------------------------------------------- #
# Kernels
# --------------------------------------------------------------------------- #
def _head_kernel_fullseq(feat_ref, w1_ref, b1_ref, w2_ref, b2_ref, out_ref):
    """1-D grid over batch tiles; the whole sequence fits in VMEM."""
    # feat_ref: [TB, S, H]; w1_ref: [H, H] (in,out); w2_ref: [H, L] (in,out)
    x = jnp.max(feat_ref[...], axis=1).astype(jnp.float32)            # [TB, H]
    h = jnp.dot(x, w1_ref[...], preferred_element_type=jnp.float32) + b1_ref[...]
    h = jnp.tanh(h)
    y = jnp.dot(h, w2_ref[...], preferred_element_type=jnp.float32) + b2_ref[...]
    out_ref[...] = y.astype(out_ref.dtype)


def _head_kernel_stream(feat_ref, w1_ref, b1_ref, w2_ref, b2_ref, out_ref, mx_ref):
    """2-D grid (batch x sequence); running max kept in a VMEM scratch."""
    s = pl.program_id(1)

    @pl.when(s == 0)
    def _():
        mx_ref[...] = jnp.full_like(mx_ref, -jnp.inf)

    # Running max over this sequence tile, in the features' native dtype.
    mx_ref[...] = jnp.maximum(mx_ref[...], jnp.max(feat_ref[...], axis=1))

    @pl.when(s == pl.num_programs(1) - 1)
    def _():
        # Only the reduced [TB, H] slab is cast to f32 for the compute epilogue.
        x = mx_ref[...].astype(jnp.float32)
        h = jnp.dot(x, w1_ref[...], preferred_element_type=jnp.float32) + b1_ref[...]
        h = jnp.tanh(h)
        y = jnp.dot(h, w2_ref[...], preferred_element_type=jnp.float32) + b2_ref[...]
        out_ref[...] = y.astype(out_ref.dtype)


# --------------------------------------------------------------------------- #
# VMEM budgeting / tile selection
# --------------------------------------------------------------------------- #
def _vmem_limit_bytes():
    """Generation-aware scoped-VMEM request: ~80% of physical, capped at 100 MiB."""
    phys = 0
    try:
        phys = int(getattr(pltpu.get_tpu_info(), "vmem_capacity_bytes", 0) or 0)
    except Exception:
        phys = 0
    if phys <= 0:
        return 64 * 1024 * 1024                       # conservative fallback
    return max(32 * 1024 * 1024, min(int(0.80 * phys), 100 * 1024 * 1024))


def _aligned_divisors(dim, align):
    """Divisors of `dim` that are multiples of `align`, descending.
    Always contains `dim` (full extent is always a legal block dim)."""
    divs = {dim}
    for d in range(align, dim, align):
        if dim % d == 0:
            divs.add(d)
    return sorted(divs, reverse=True)


def _choose_tiles(B, S, H, L, feat_bytes, w_bytes, vmem_limit):
    """Pick (TB, TS) so that double-buffered feature tiles + resident weights +
    scratch fit ~70% of the requested VMEM limit."""
    budget = int(0.70 * vmem_limit)
    # Resident weights/biases; counted double-buffered so the estimate stays
    # safe even if the single-buffer request is unsupported and we fall back.
    fixed = 2 * ((H * H + H * L) * w_bytes + (H + L) * 4)
    align = max(8, 32 // feat_bytes)                  # 8 f32, 16 bf16, 32 int8/fp8

    def fits(tb, ts):
        feat = 2 * tb * ts * H * feat_bytes           # double-buffered feature stream
        mx = tb * H * feat_bytes                      # running-max scratch
        outbuf = 2 * tb * max(L, 128) * 4             # double-buffered, lane-padded out
        epi = 2 * tb * H * 4                          # f32 epilogue temporaries
        return fixed + feat + mx + outbuf + epi <= budget

    tb_cands = [d for d in _aligned_divisors(B, align) if d <= 128]
    if not tb_cands:
        tb_cands = [min(_aligned_divisors(B, align))]
    # Prefer >= 2 batch tiles so the "parallel" batch axis can use both v7x TCs.
    split = [t for t in tb_cands if B // t >= 2]
    tb_cands = split + [t for t in tb_cands if t not in split]

    ts_cands = _aligned_divisors(S, align)

    for tb in tb_cands:
        for ts in ts_cands:
            if fits(tb, ts):
                return tb, ts
    return tb_cands[-1], ts_cands[-1]                 # best effort: smallest tiles


# --------------------------------------------------------------------------- #
# Wrapper
# --------------------------------------------------------------------------- #
def _build_and_call(features, w1, b1, w2, b2, vmem_limit, single_buffer_resident):
    B, S, H = features.shape
    L = w2.shape[1]
    feat_bytes = jnp.dtype(features.dtype).itemsize
    w_bytes = jnp.dtype(w1.dtype).itemsize
    TB, TS = _choose_tiles(B, S, H, L, feat_bytes, w_bytes, vmem_limit)

    def resident(shape):
        # Block never changes across the grid: keep it VMEM-resident and, when
        # supported, single-buffered (reclaims VMEM for bigger feature tiles).
        idx = lambda *_: (0,) * len(shape)
        if single_buffer_resident:
            return pl.BlockSpec(shape, idx, pipeline_mode=pl.Buffered(1))
        return pl.BlockSpec(shape, idx)

    weight_specs = [resident((H, H)), resident((1, H)),
                    resident((H, L)), resident((1, L))]

    if TS == S:
        # Whole sequence per batch tile: 1-D grid, no scratch, no pl.when.
        grid = (B // TB,)
        feat_spec = pl.BlockSpec((TB, S, H), lambda i: (i, 0, 0))
        out_spec = pl.BlockSpec((TB, L), lambda i: (i, 0))
        kernel = _head_kernel_fullseq
        scratch = []
        dims = ("parallel",)
    else:
        # Stream sequence tiles; running max in VMEM scratch; epilogue on last tile.
        grid = (B // TB, S // TS)
        feat_spec = pl.BlockSpec((TB, TS, H), lambda i, s: (i, s, 0))
        out_spec = pl.BlockSpec((TB, L), lambda i, s: (i, 0))
        kernel = _head_kernel_stream
        scratch = [pltpu.VMEM((TB, H), features.dtype)]
        dims = ("parallel", "arbitrary")

    return pl.pallas_call(
        kernel,
        out_shape=jax.ShapeDtypeStruct((B, L), jnp.float32),
        grid_spec=pltpu.PrefetchScalarGridSpec(
            num_scalar_prefetch=0,
            grid=grid,
            in_specs=[feat_spec] + weight_specs,
            out_specs=out_spec,
            scratch_shapes=scratch,
        ),
        compiler_params=pltpu.CompilerParams(
            dimension_semantics=dims,
            vmem_limit_bytes=vmem_limit,
        ),
    )(features, w1, b1, w2, b2)


def roberta_classification_head(features, w_dense, b_dense, w_out, b_out):
    """features: [B, S, H] (f32 or bf16).
    w_dense: [H, H] torch layout [out, in], b_dense: [H]
    w_out:   [L, H] torch layout [out, in], b_out:   [L]
    Returns logits [B, L] float32.  Forward / eval-mode only (dropout = identity).
    """
    B, S, H = features.shape
    L = w_out.shape[0]

    # One-time HBM-side transposes to [in, out] so the in-kernel epilogue is a
    # plain (m,k)x(k,n) MXU feed (amortized over the whole grid / across calls).
    w1 = jnp.asarray(w_dense).T                       # [H, H]  (in, out)
    w2 = jnp.asarray(w_out).T                         # [H, L]  (in, out)
    b1 = jnp.asarray(b_dense, jnp.float32).reshape(1, H)
    b2 = jnp.asarray(b_out, jnp.float32).reshape(1, L)

    vmem_limit = _vmem_limit_bytes()
    try:
        return _build_and_call(features, w1, b1, w2, b2, vmem_limit, True)
    except Exception:
        # Fallback: default (double) buffering + conservative VMEM limit,
        # e.g. if pipeline_mode=pl.Buffered(1) is unsupported in this JAX build.
        return _build_and_call(features, w1, b1, w2, b2,
                               min(vmem_limit, 64 * 1024 * 1024), False)


if __name__ == "__main__":
    # Small synthetic config: batch=2, seq=8, hidden=32, num_labels=4
    B, S, H, L = 2, 8, 32, 4

    key = jax.random.PRNGKey(0)
    k_feat, k_w1, k_b1, k_w2, k_b2 = jax.random.split(key, 5)

    features = jax.random.normal(k_feat, (B, S, H), dtype=jnp.float32)
    # torch layout: [out_features, in_features]
    w_dense = jax.random.uniform(k_w1, (H, H), jnp.float32, -0.1, 0.1)
    b_dense = jax.random.uniform(k_b1, (H,), jnp.float32, -0.1, 0.1)
    w_out = jax.random.uniform(k_w2, (L, H), jnp.float32, -0.1, 0.1)
    b_out = jax.random.uniform(k_b2, (L,), jnp.float32, -0.1, 0.1)

    logits = roberta_classification_head(features, w_dense, b_dense, w_out, b_out)
    jax.block_until_ready(logits)

    # Pure-JAX reference (dropout = identity in eval mode).
    x_ref = jnp.max(features, axis=1)
    h_ref = jnp.tanh(x_ref @ w_dense.T + b_dense)
    y_ref = h_ref @ w_out.T + b_out
    assert jnp.allclose(logits, y_ref, atol=1e-5), "mismatch vs reference"

    print("KERNEL_OK")
</pallas_src>

<mosaic_0001>
module attributes {stable_mosaic.version = 11 : i64} {
  func.func @_head_kernel_fullseq(%arg0: i32, %arg1: memref<2x8x32xf32, #tpu.memory_space<vmem>>, %arg2: memref<32x32xf32, #tpu.memory_space<vmem>>, %arg3: memref<1x32xf32, #tpu.memory_space<vmem>>, %arg4: memref<32x4xf32, #tpu.memory_space<vmem>>, %arg5: memref<1x4xf32, #tpu.memory_space<vmem>>, %arg6: memref<2x4xf32, #tpu.memory_space<vmem>>) attributes {dimension_semantics = [#tpu.dimension_semantics<parallel>], iteration_bounds = array<i64: 1>, scalar_prefetch = 0 : i64, scratch_operands = 0 : i64, tpu.core_type = #tpu.core_type<tc>, window_params = [{transform_indices = @transform_0, window_bounds = array<i64: 2, 8, 32>}, {pipeline_mode = #tpu.pipeline_mode<synchronous>, transform_indices = @transform_1, window_bounds = array<i64: 32, 32>}, {pipeline_mode = #tpu.pipeline_mode<synchronous>, transform_indices = @transform_2, window_bounds = array<i64: 1, 32>}, {pipeline_mode = #tpu.pipeline_mode<synchronous>, transform_indices = @transform_3, window_bounds = array<i64: 32, 4>}, {pipeline_mode = #tpu.pipeline_mode<synchronous>, transform_indices = @transform_4, window_bounds = array<i64: 1, 4>}, {transform_indices = @transform_5, window_bounds = array<i64: 2, 4>}]} {
    %c0 = arith.constant 0 : index
    %c0_0 = arith.constant 0 : index
    %c0_1 = arith.constant 0 : index
    %0 = vector.load %arg1[%c0, %c0_0, %c0_1] : memref<2x8x32xf32, #tpu.memory_space<vmem>>, vector<2x8x32xf32>
    %cst = arith.constant dense<0xFF800000> : vector<2x32xf32>
    %1 = vector.multi_reduction <maximumf>, %0, %cst [1] : vector<2x8x32xf32> to vector<2x32xf32>
    %c0_2 = arith.constant 0 : index
    %c0_3 = arith.constant 0 : index
    %2 = vector.load %arg2[%c0_2, %c0_3] : memref<32x32xf32, #tpu.memory_space<vmem>>, vector<32x32xf32>
    %cst_4 = arith.constant dense<0.000000e+00> : vector<2x32xf32>
    %3 = tpu.matmul %1, %2, %cst_4 {dimension_numbers = #tpu.dot_dimension_numbers<[1], [0], [0], [1], [0, 0, 1, 1], [], []>} : vector<2x32xf32>, vector<32x32xf32>, vector<2x32xf32> -> vector<2x32xf32>
    %c0_5 = arith.constant 0 : index
    %c0_6 = arith.constant 0 : index
    %4 = vector.load %arg3[%c0_5, %c0_6] : memref<1x32xf32, #tpu.memory_space<vmem>>, vector<1x32xf32>
    %5 = vector.broadcast %4 : vector<1x32xf32> to vector<2x32xf32>
    %6 = arith.addf %3, %5 : vector<2x32xf32>
    %7 = math.tanh %6 : vector<2x32xf32>
    %c0_7 = arith.constant 0 : index
    %c0_8 = arith.constant 0 : index
    %8 = vector.load %arg4[%c0_7, %c0_8] : memref<32x4xf32, #tpu.memory_space<vmem>>, vector<32x4xf32>
    %cst_9 = arith.constant dense<0.000000e+00> : vector<2x4xf32>
    %9 = tpu.matmul %7, %8, %cst_9 {dimension_numbers = #tpu.dot_dimension_numbers<[1], [0], [0], [1], [0, 0, 1, 1], [], []>} : vector<2x32xf32>, vector<32x4xf32>, vector<2x4xf32> -> vector<2x4xf32>
    %c0_10 = arith.constant 0 : index
    %c0_11 = arith.constant 0 : index
    %10 = vector.load %arg5[%c0_10, %c0_11] : memref<1x4xf32, #tpu.memory_space<vmem>>, vector<1x4xf32>
    %11 = vector.broadcast %10 : vector<1x4xf32> to vector<2x4xf32>
    %12 = arith.addf %9, %11 : vector<2x4xf32>
    %c0_12 = arith.constant 0 : index
    %c0_13 = arith.constant 0 : index
    %13 = vector.load %arg6[%c0_12, %c0_13] : memref<2x4xf32, #tpu.memory_space<vmem>>, vector<2x4xf32>
    tpu.vector_store %arg6[%c0_12, %c0_13], %12 {strides = array<i32>} : memref<2x4xf32, #tpu.memory_space<vmem>>, vector<2x4xf32>,
    return
  }
  func.func @transform_0(%arg0: i32) -> (i32, i32, i32) {
    %c0_i32 = arith.constant 0 : i32
    %c0_i32_0 = arith.constant 0 : i32
    %c0_i32_1 = arith.constant 0 : i32
    return %arg0, %c0_i32, %c0_i32_0 : i32, i32, i32
  }
  func.func @transform_1(%arg0: i32) -> (i32, i32) {
    %c0_i32 = arith.constant 0 : i32
    %c0_i32_0 = arith.constant 0 : i32
    %c0_i32_1 = arith.constant 0 : i32
    return %c0_i32, %c0_i32_0 : i32, i32
  }
  func.func @transform_2(%arg0: i32) -> (i32, i32) {
    %c0_i32 = arith.constant 0 : i32
    %c0_i32_0 = arith.constant 0 : i32
    %c0_i32_1 = arith.constant 0 : i32
    return %c0_i32, %c0_i32_0 : i32, i32
  }
  func.func @transform_3(%arg0: i32) -> (i32, i32) {
    %c0_i32 = arith.constant 0 : i32
    %c0_i32_0 = arith.constant 0 : i32
    %c0_i32_1 = arith.constant 0 : i32
    return %c0_i32, %c0_i32_0 : i32, i32
  }
  func.func @transform_4(%arg0: i32) -> (i32, i32) {
    %c0_i32 = arith.constant 0 : i32
    %c0_i32_0 = arith.constant 0 : i32
    %c0_i32_1 = arith.constant 0 : i32
    return %c0_i32, %c0_i32_0 : i32, i32
  }
  func.func @transform_5(%arg0: i32) -> (i32, i32) {
    %c0_i32 = arith.constant 0 : i32
    %c0_i32_0 = arith.constant 0 : i32
    return %arg0, %c0_i32 : i32, i32
  }
}

module attributes {stable_mosaic.version = 11 : i64} {
  func.func @_head_kernel_fullseq(%arg0: i32, %arg1: memref<2x8x32xf32, #tpu.memory_space<vmem>>, %arg2: memref<32x32xf32, #tpu.memory_space<vmem>>, %arg3: memref<1x32xf32, #tpu.memory_space<vmem>>, %arg4: memref<32x4xf32, #tpu.memory_space<vmem>>, %arg5: memref<1x4xf32, #tpu.memory_space<vmem>>, %arg6: memref<2x4xf32, #tpu.memory_space<vmem>>) attributes {dimension_semantics = [#tpu.dimension_semantics<parallel>], iteration_bounds = array<i64: 1>, scalar_prefetch = 0 : i64, scratch_operands = 0 : i64, tpu.core_type = #tpu.core_type<tc>, window_params = [{transform_indices = @transform_0, window_bounds = array<i64: 2, 8, 32>}, {pipeline_mode = #tpu.pipeline_mode<synchronous>, transform_indices = @transform_1, window_bounds = array<i64: 32, 32>}, {pipeline_mode = #tpu.pipeline_mode<synchronous>, transform_indices = @transform_2, window_bounds = array<i64: 1, 32>}, {pipeline_mode = #tpu.pipeline_mode<synchronous>, transform_indices = @transform_3, window_bounds = array<i64: 32, 4>}, {pipeline_mode = #tpu.pipeline_mode<synchronous>, transform_indices = @transform_4, window_bounds = array<i64: 1, 4>}, {transform_indices = @transform_5, window_bounds = array<i64: 2, 4>}]} {
    %c0 = arith.constant 0 : index
    %c0_0 = arith.constant 0 : index
    %c0_1 = arith.constant 0 : index
    %0 = vector.load %arg1[%c0, %c0_0, %c0_1] : memref<2x8x32xf32, #tpu.memory_space<vmem>>, vector<2x8x32xf32>
    %cst = arith.constant dense<0xFF800000> : vector<2x32xf32>
    %1 = vector.multi_reduction <maximumf>, %0, %cst [1] : vector<2x8x32xf32> to vector<2x32xf32>
    %c0_2 = arith.constant 0 : index
    %c0_3 = arith.constant 0 : index
    %2 = vector.load %arg2[%c0_2, %c0_3] : memref<32x32xf32, #tpu.memory_space<vmem>>, vector<32x32xf32>
    %cst_4 = arith.constant dense<0.000000e+00> : vector<2x32xf32>
    %3 = tpu.matmul %1, %2, %cst_4 {dimension_numbers = #tpu.dot_dimension_numbers<[1], [0], [0], [1], [0, 0, 1, 1], [], []>} : vector<2x32xf32>, vector<32x32xf32>, vector<2x32xf32> -> vector<2x32xf32>
    %c0_5 = arith.constant 0 : index
    %c0_6 = arith.constant 0 : index
    %4 = vector.load %arg3[%c0_5, %c0_6] : memref<1x32xf32, #tpu.memory_space<vmem>>, vector<1x32xf32>
    %5 = vector.broadcast %4 : vector<1x32xf32> to vector<2x32xf32>
    %6 = arith.addf %3, %5 : vector<2x32xf32>
    %7 = math.tanh %6 : vector<2x32xf32>
    %c0_7 = arith.constant 0 : index
    %c0_8 = arith.constant 0 : index
    %8 = vector.load %arg4[%c0_7, %c0_8] : memref<32x4xf32, #tpu.memory_space<vmem>>, vector<32x4xf32>
    %cst_9 = arith.constant dense<0.000000e+00> : vector<2x4xf32>
    %9 = tpu.matmul %7, %8, %cst_9 {dimension_numbers = #tpu.dot_dimension_numbers<[1], [0], [0], [1], [0, 0, 1, 1], [], []>} : vector<2x32xf32>, vector<32x4xf32>, vector<2x4xf32> -> vector<2x4xf32>
    %c0_10 = arith.constant 0 : index
    %c0_11 = arith.constant 0 : index
    %10 = vector.load %arg5[%c0_10, %c0_11] : memref<1x4xf32, #tpu.memory_space<vmem>>, vector<1x4xf32>
    %11 = vector.broadcast %10 : vector<1x4xf32> to vector<2x4xf32>
    %12 = arith.addf %9, %11 : vector<2x4xf32>
    %c0_12 = arith.constant 0 : index
    %c0_13 = arith.constant 0 : index
    %13 = vector.load %arg6[%c0_12, %c0_13] : memref<2x4xf32, #tpu.memory_space<vmem>>, vector<2x4xf32>
    tpu.vector_store %arg6[%c0_12, %c0_13], %12 {strides = array<i32>} : memref<2x4xf32, #tpu.memory_space<vmem>>, vector<2x4xf32>,
    return
  }
  func.func @transform_0(%arg0: i32) -> (i32, i32, i32) {
    %c0_i32 = arith.constant 0 : i32
    %c0_i32_0 = arith.constant 0 : i32
    %c0_i32_1 = arith.constant 0 : i32
    return %arg0, %c0_i32, %c0_i32_0 : i32, i32, i32
  }
  func.func @transform_1(%arg0: i32) -> (i32, i32) {
    %c0_i32 = arith.constant 0 : i32
    %c0_i32_0 = arith.constant 0 : i32
    %c0_i32_1 = arith.constant 0 : i32
    return %c0_i32, %c0_i32_0 : i32, i32
  }
  func.func @transform_2(%arg0: i32) -> (i32, i32) {
    %c0_i32 = arith.constant 0 : i32
    %c0_i32_0 = arith.constant 0 : i32
    %c0_i32_1 = arith.constant 0 : i32
    return %c0_i32, %c0_i32_0 : i32, i32
  }
  func.func @transform_3(%arg0: i32) -> (i32, i32) {
    %c0_i32 = arith.constant 0 : i32
    %c0_i32_0 = arith.constant 0 : i32
    %c0_i32_1 = arith.constant 0 : i32
    return %c0_i32, %c0_i32_0 : i32, i32
  }
  func.func @transform_4(%arg0: i32) -> (i32, i32) {
    %c0_i32 = arith.constant 0 : i32
    %c0_i32_0 = arith.constant 0 : i32
    %c0_i32_1 = arith.constant 0 : i32
    return %c0_i32, %c0_i32_0 : i32, i32
  }
  func.func @transform_5(%arg0: i32) -> (i32, i32) {
    %c0_i32 = arith.constant 0 : i32
    %c0_i32_0 = arith.constant 0 : i32
    return %arg0, %c0_i32 : i32, i32
  }
}

</mosaic_0001>

<bundles_post_ra>
// kernel: tpu_custom_call.1
= control target key start
LH: loop header
LB: loop body
LE: loop exit
PB: predicated region body
PF: predicated region fallthrough
CT: control target
= control target key end

     0   :  { %10 = vsyncpa [#allocation3], 0  ;;  %s627_s0 = inlined_call_operand.hbm [shape: f32[2,8,32], index: 0, kind: input, shape index: {}]   ;;  %s628_s1 = inlined_call_operand.hbm [shape: f32[32,32], index: 1, kind: input, shape index: {}]   ;;  %s629_s2 = inlined_call_operand.hbm [shape: f32[1,32], index: 2, kind: input, shape index: {}]   ;;  %s630_s3 = inlined_call_operand.hbm [shape: f32[32,4], index: 3, kind: input, shape index: {}]   ;;  %s631_s4 = inlined_call_operand.hbm [shape: f32[1,4], index: 4, kind: input, shape index: {}]   ;;  %s632_s5 = inlined_call_operand.hbm [shape: f32[2,4], index: 5, kind: output, shape index: {}]  }
   0x1   :  { %11 = vsyncpa [#allocation6], 0 }
   0x2   :  { %12 = vsyncpa [#allocation9], 0 }
   0x3   :  { %13 = vsyncpa [#allocation4], 0  ;;  %s494_s18 = smov [#allocation5]   ;;  %s495_s20 = smov [#allocation8]  }
   0x4   :  { %s31_s19 = sshll.u32 %s494_s18, 4  ;;  %s53_s21 = sshll.u32 %s495_s20, 4  ;;  %s32_s19 = int_to_ptr.vmem [resolvable:$true] %s31_s19  ;;  %s535_s21 = int_to_ptr.vmem [resolvable:$true] %s53_s21 }
   0x5   :  { %s354_s24 = scalar_lea.hbm %s628_s1, 512 }
   0x6   :  { %p355_p0 = scmp.ne.s32.totalorder %s628_s1, %s354_s24  ;;  %p358_p1 = scmp.lt.u32.totalorder %s354_s24, %s628_s1 }
   0x8   :  { %p360_p2 = pnand %p358_p1, %p355_p0 }
   0xa   :  { %363 = shalt.err (!%p360_p2)
}
   0xb   :  { %s364_s29 = scalar_lea.vmem %s32_s19, 512  ;;  %p369_p4 = scmp.lt.s32.totalorder %s32_s19, %s32_s19 }
   0xc   :  { %p365_p3 = scmp.ne.s32.totalorder %s32_s19, %s364_s29  ;;  %p370_p5 = scmp.lt.s32.totalorder %s364_s29, %s364_s29 }
   0xe   :  { %p371_p6 = por %p370_p5, %p369_p4 }
  0x10   :  { %p372_p7 = pnand %p371_p6, %p365_p3 }
  0x12   :  { %375 = shalt.err (!%p372_p7)
}
  0x13   :  { %s496_s30 = smov 128   ;;  %s497_s6 = smov 8  }
  0x14   :  { %37 = dma.hbm_to_vmem [thread:$0]  %s628_s1, 512, %s32_s19, [#allocation6], %s496_s30, %s496_s30, %s497_s6  }
  0x15   :  { %s376_s11 = scalar_lea.hbm %s630_s3, 512 }
  0x16   :  { %p377_p8 = scmp.ne.s32.totalorder %s630_s3, %s376_s11  ;;  %p380_p9 = scmp.lt.u32.totalorder %s376_s11, %s630_s3 }
  0x18   :  { %p382_p10 = pnand %p380_p9, %p377_p8 }
  0x1a   :  { %385 = shalt.err (!%p382_p10)
}
  0x1b   :  { %s386_s16 = scalar_lea.vmem %s535_s21, 512  ;;  %p391_p12 = scmp.lt.s32.totalorder %s535_s21, %s535_s21 }
  0x1c   :  { %p387_p11 = scmp.ne.s32.totalorder %s535_s21, %s386_s16  ;;  %p392_p13 = scmp.lt.s32.totalorder %s386_s16, %s386_s16 }
  0x1e   :  { %p393_p0 = por %p392_p13, %p391_p12 }
  0x20   :  { %p394_p1 = pnand %p393_p0, %p387_p11 }
  0x22   :  { %397 = shalt.err (!%p394_p1)
}
  0x23   :  { %59 = dma.hbm_to_vmem [thread:$0]  %s630_s3, 512, %s535_s21, [#allocation9], %s496_s30, %s496_s30, %s497_s6  }
  0x24   :  { %s498_s18 = smov [#allocation2]   ;;  %s499_s20 = smov [#allocation7]  }
  0x25   :  { %s19_s19 = sshll.u32 %s498_s18, 4  ;;  %s44_s22 = sshll.u32 %s499_s20, 4  ;;  %s20_s19 = int_to_ptr.vmem [resolvable:$true] %s19_s19  ;;  %s45_s22 = int_to_ptr.vmem [resolvable:$true] %s44_s22 }
  0x26   :  { %s398_s25 = scalar_lea.hbm %s627_s0, 256 }
  0x27   :  { %p399_p2 = scmp.ne.s32.totalorder %s627_s0, %s398_s25  ;;  %p402_p3 = scmp.lt.u32.totalorder %s398_s25, %s627_s0 }
  0x29   :  { %p404_p4 = pnand %p402_p3, %p399_p2 }
  0x2b   :  { %407 = shalt.err (!%p404_p4)
}
  0x2c   :  { %s408_s3 = scalar_lea.vmem %s20_s19, 256  ;;  %p413_p6 = scmp.lt.s32.totalorder %s20_s19, %s20_s19 }
  0x2d   :  { %p409_p5 = scmp.ne.s32.totalorder %s20_s19, %s408_s3  ;;  %p414_p7 = scmp.lt.s32.totalorder %s408_s3, %s408_s3 }
  0x2f   :  { %p415_p8 = por %p414_p7, %p413_p6 }
  0x31   :  { %p416_p9 = pnand %p415_p8, %p409_p5 }
  0x33   :  { %419 = shalt.err (!%p416_p9)
}
  0x34   :  { %25 = dma.hbm_to_vmem [thread:$0]  %s627_s0, 256, %s20_s19, [#allocation3], %s496_s30, %s496_s30, %s497_s6  }
  0x35   :  { %s420_s10 = scalar_lea.hbm %s629_s2, 16 }
  0x36   :  { %p421_p10 = scmp.ne.s32.totalorder %s629_s2, %s420_s10  ;;  %p424_p11 = scmp.lt.u32.totalorder %s420_s10, %s629_s2 }
  0x38   :  { %p426_p12 = pnand %p424_p11, %p421_p10 }
  0x3a   :  { %429 = shalt.err (!%p426_p12)
}
  0x3b   :  { %s430_s15 = scalar_lea.vmem %s45_s22, 16  ;;  %s434_s16 = scalar_lea.vmem %s45_s22, 32 }
  0x3c   :  { %p431_p13 = scmp.ne.s32.totalorder %s45_s22, %s430_s15  ;;  %p435_p0 = scmp.lt.s32.totalorder %s45_s22, %s45_s22 }
  0x3d   :  { %p436_p1 = scmp.lt.s32.totalorder %s434_s16, %s430_s15 }
  0x3f   :  { %p437_p2 = por %p436_p1, %p435_p0 }
  0x41   :  { %p438_p3 = pnand %p437_p2, %p431_p13 }
  0x43   :  { %441 = shalt.err (!%p438_p3)
}
  0x44   :  { %47 = dma.hbm_to_vmem [thread:$0]  %s629_s2, 16, %s45_s22, [#allocation6]  }
  0x45   :  { %s500_s6 = smov [#allocation10]   ;;  %s442_s19 = scalar_lea.hbm %s631_s4, 16 }
  0x46   :  { %s66_s1 = sshll.u32 %s500_s6, 4  ;;  %p443_p4 = scmp.ne.s32.totalorder %s631_s4, %s442_s19  ;;  %s67_s1 = int_to_ptr.vmem [resolvable:$true] %s66_s1 }
  0x47   :  { %p446_p5 = scmp.lt.u32.totalorder %s442_s19, %s631_s4 }
  0x49   :  { %p448_p6 = pnand %p446_p5, %p443_p4 }
  0x4b   :  { %451 = shalt.err (!%p448_p6)
}
  0x4c   :  { %s452_s26 = scalar_lea.vmem %s67_s1, 16  ;;  %s456_s2 = scalar_lea.vmem %s67_s1, 32 }
  0x4d   :  { %p453_p7 = scmp.ne.s32.totalorder %s67_s1, %s452_s26  ;;  %p457_p8 = scmp.lt.s32.totalorder %s67_s1, %s67_s1 }
  0x4e   :  { %p458_p9 = scmp.lt.s32.totalorder %s456_s2, %s452_s26 }
  0x50   :  { %p459_p10 = por %p458_p9, %p457_p8 }
  0x52   :  { %p460_p11 = pnand %p459_p10, %p453_p7 }
  0x54   :  { %463 = shalt.err (!%p460_p11)
}
  0x55   :  { %69 = dma.hbm_to_vmem [thread:$0]  %s631_s4, 16, %s67_s1, [#allocation9]  }
  0x56   :  { %486 = dma.done.wait [#allocation3], 256  }
  0x57   :  { %487 = vsyncadd [#allocation3], 4294967040 }
  0x58   :  { %488 = dma.done.wait [#allocation6], 528  }
  0x59   :  { %489 = vsyncadd [#allocation6], 4294966768 }
  0x5a   :  { %490 = dma.done.wait [#allocation9], 528  }
  0x5b   :  { %491 = vsyncadd [#allocation9], 4294966768  ;;  %v501_v0 = vmov 0.0|0.0   ;;  %vm502_vm0 = vmmov 0   ;;  %v503_v1 = vmov 0.0   ;;  %vm87_vm1 = vcmask 261120  }
  0x5c   :  { %329 = vmatprep.subr.bf16.mxu0 %v501_v0  ;;  %315 = vmatprep.mubr.msk.f32.mxu0 %vm502_vm0, %v503_v1  ;;  %v102_v2 = vld [vmem:[#allocation5] sm:$0xff]  ;;  %v103_v3 = vld [vmem:[#allocation5 + $0x8] sm:$0xff]  ;;  %v104_v4 = vld [vmem:[#allocation5 + $0x10] sm:$0xff]  ;;  %vm115_vm2 = vcmask 1041409   ;;  %s504_s4 = smov [#allocation11]   ;;  %vm274_vm3 = vcmask 25600  }
  0x5d   :  { %335 = vmatprep.subr.bf16.mxu1 %v501_v0  ;;  %326 = vmatprep.mubr.msk.f32.mxu1 %vm502_vm0, %v503_v1  ;;  %v330_v5 = vpack.c.bf16 %v103_v3, %v102_v2  ;;  %v105_v6 = vld [vmem:[#allocation5 + $0x18] sm:$0xff]  ;;  %v85_v7 = vld [vmem:[#allocation2] sm:$0xff]  ;;  %v190_v25 = vld [vmem:[#allocation8] sm:$0xff]  ;;  %s282_s28 = sshll.u32 %s504_s4, 4  ;;  %s283_s28 = int_to_ptr.vmem [resolvable:$true] %s282_s28 }
  0x5e   :  { %v86_v8 = vld [vmem:[#allocation2 + $0x8] sm:$0xff]  ;;  %v88_v9 = vsel %vm87_vm1, %v85_v7, -inf  ;;  %v333_v11 = vpack.c.bf16 %v105_v6, %v104_v4  ;;  %v191_v26 = vld [vmem:[#allocation8 + $0x8] sm:$0xff]  ;;  %v293_v31 = vld [vmem:[#allocation7] ss:$0 sm:$0xff]  ;;  %s464_s29 = scalar_lea.vmem %s283_s28, 32  ;;  %p469_p13 = scmp.lt.s32.totalorder %s283_s28, %s283_s28 }
  0x5f   :  { %v95_v10 = vsel %vm87_vm1, %v86_v8, -inf  ;;  %331 = vmatpush3.bf16.msra.mxu0 %v330_v5  ;;  %v89_v12 = vrot.slane %v88_v9, 4  ;;  %v192_v27 = vld [vmem:[#allocation8 + $0x10] sm:$0xff]  ;;  %v336_v28 = vpack.c.bf16 %v191_v26, %v190_v25  ;;  %v193_v29 = vld [vmem:[#allocation8 + $0x18] sm:$0xff]  ;;  %v295_v36 = vld [vmem:[#allocation10] ss:$0 sm:$0xff]  ;;  %p465_p12 = scmp.ne.s32.totalorder %s283_s28, %s464_s29  ;;  %p470_p0 = scmp.lt.s32.totalorder %s464_s29, %s464_s29 }
  0x60   :  { %v96_v13 = vrot.slane %v95_v10, 4  ;;  %332 = vmatprep.subr.bf16.mxu0 %v501_v0  ;;  %v339_v30 = vpack.c.bf16 %v193_v29, %v192_v27 }
  0x61   :  { %v90_v14 = vmax.f32 %v88_v9, %v89_v12  ;;  %337 = vmatpush3.bf16.msra.mxu1 %v336_v28  ;;  %p471_p1 = por %p470_p0, %p469_p13 }
  0x62   :  { %v97_v15 = vmax.f32 %v95_v10, %v96_v13  ;;  %338 = vmatprep.subr.bf16.mxu1 %v501_v0 }
  0x63   :  { %334 = vmatpush3.bf16.msra.mxu0 %v333_v11  ;;  %v91_v16 = vrot.slane %v90_v14, 2  ;;  %p472_p2 = pnand %p471_p1, %p465_p12 }
  0x64   :  { %v98_v17 = vrot.slane %v97_v15, 2 }
  0x65   :  { %v92_v18 = vmax.f32 %v90_v14, %v91_v16  ;;  %340 = vmatpush3.bf16.msra.mxu1 %v339_v30 }
  0x66   :  { %v99_v19 = vmax.f32 %v97_v15, %v98_v17 }
  0x67   :  { %v93_v20 = vrot.slane %v92_v18, 1 }
  0x68   :  { %v100_v21 = vrot.slane %v99_v19, 1 }
  0x69   :  { %v94_v22 = vmax.f32 %v92_v18, %v93_v20 }
  0x6a   :  { %v101_v23 = vmax.f32 %v99_v19, %v100_v21 }
  0x6c   :  { %v116_v24 = vsel %vm115_vm2, %v101_v23, %v94_v22 }
  0x6d   :  { %316 = vmatmul.mubr.msk.f32.vlgmr.msra.gmra.mrb[0].mxu0 %vm87_vm1, %v116_v24 }
 0x140   :  { %v185_v32 = vpop.f32.mrb[0].mxu0 }
 0x141   :  { %v186_v33 = vadd.f32 %v293_v31, %v185_v32  ;;  %v317_v34 = vpop.f32.mrb[1].mxu0 }
 0x143   :  { %352 = vtanh.f32 %v186_v33 }
 0x14d   :  { %v353_v35 = vpop.eup %352 }
 0x14e   :  { %327 = vmatmul.mubr.msk.f32.vlgmr.msra.gmra.mrb[0].mxu1 %vm87_vm1, %v353_v35 }
 0x221   :  { %v270_v37 = vpop.f32.mrb[0].mxu1 }
 0x222   :  { %v271_v38 = vadd.f32 %v295_v36, %v270_v37  ;;  %v328_v39 = vpop.f32.mrb[1].mxu1 }
 0x224   :  { %275 = vst.msk [vmem:[#allocation11] sm:$0x3] %vm274_vm3, %v271_v38 }
 0x225   :  { %475 = shalt.err (!%p472_p2)
}
 0x226   :  { %s476_s7 = scalar_lea.hbm %s632_s5, 32 }
 0x227   :  { %p477_p3 = scmp.ne.s32.totalorder %s632_s5, %s476_s7  ;;  %p480_p4 = scmp.lt.u32.totalorder %s476_s7, %s632_s5 }
 0x229   :  { %p482_p5 = pnand %p480_p4, %p477_p3 }
 0x22b   :  { %485 = shalt.err (!%p482_p5)
}
 0x22c   :  { %285 = dma.vmem_to_hbm [thread:$0]  %s283_s28, 32, %s632_s5, [#allocation4]  }
 0x22d   :  { %492 = dma.done.wait [#allocation4], 32  }
 0x22e   :  { %493 = vsyncadd [#allocation4], 4294967264 }
 0x22f   :  { %289 = vsyncpa [#allocation3], 1 }
 0x230   :  { %290 = vsyncpa [#allocation6], 1 }
 0x231   :  { %291 = vsyncpa [#allocation9], 1 }
 0x232   :  { %292 = vsyncpa [#allocation4], 1 }

// kernel: tpu_custom_call.1
= control target key start
LH: loop header
LB: loop body
LE: loop exit
PB: predicated region body
PF: predicated region fallthrough
CT: control target
= control target key end

     0   :  { %10 = vsyncpa [#allocation3], 0  ;;  %s627_s0 = inlined_call_operand.hbm [shape: f32[2,8,32], index: 0, kind: input, shape index: {}]   ;;  %s628_s1 = inlined_call_operand.hbm [shape: f32[32,32], index: 1, kind: input, shape index: {}]   ;;  %s629_s2 = inlined_call_operand.hbm [shape: f32[1,32], index: 2, kind: input, shape index: {}]   ;;  %s630_s3 = inlined_call_operand.hbm [shape: f32[32,4], index: 3, kind: input, shape index: {}]   ;;  %s631_s4 = inlined_call_operand.hbm [shape: f32[1,4], index: 4, kind: input, shape index: {}]   ;;  %s632_s5 = inlined_call_operand.hbm [shape: f32[2,4], index: 5, kind: output, shape index: {}]  }
   0x1   :  { %11 = vsyncpa [#allocation6], 0 }
   0x2   :  { %12 = vsyncpa [#allocation9], 0 }
   0x3   :  { %13 = vsyncpa [#allocation4], 0  ;;  %s494_s18 = smov [#allocation5]   ;;  %s495_s20 = smov [#allocation8]  }
   0x4   :  { %s31_s19 = sshll.u32 %s494_s18, 4  ;;  %s53_s21 = sshll.u32 %s495_s20, 4  ;;  %s32_s19 = int_to_ptr.vmem [resolvable:$true] %s31_s19  ;;  %s535_s21 = int_to_ptr.vmem [resolvable:$true] %s53_s21 }
   0x5   :  { %s354_s24 = scalar_lea.hbm %s628_s1, 512 }
   0x6   :  { %p355_p0 = scmp.ne.s32.totalorder %s628_s1, %s354_s24  ;;  %p358_p1 = scmp.lt.u32.totalorder %s354_s24, %s628_s1 }
   0x8   :  { %p360_p2 = pnand %p358_p1, %p355_p0 }
   0xa   :  { %363 = shalt.err (!%p360_p2)
}
   0xb   :  { %s364_s29 = scalar_lea.vmem %s32_s19, 512  ;;  %p369_p4 = scmp.lt.s32.totalorder %s32_s19, %s32_s19 }
   0xc   :  { %p365_p3 = scmp.ne.s32.totalorder %s32_s19, %s364_s29  ;;  %p370_p5 = scmp.lt.s32.totalorder %s364_s29, %s364_s29 }
   0xe   :  { %p371_p6 = por %p370_p5, %p369_p4 }
  0x10   :  { %p372_p7 = pnand %p371_p6, %p365_p3 }
  0x12   :  { %375 = shalt.err (!%p372_p7)
}
  0x13   :  { %s496_s30 = smov 128   ;;  %s497_s6 = smov 8  }
  0x14   :  { %37 = dma.hbm_to_vmem [thread:$0]  %s628_s1, 512, %s32_s19, [#allocation6], %s496_s30, %s496_s30, %s497_s6  }
  0x15   :  { %s376_s11 = scalar_lea.hbm %s630_s3, 512 }
  0x16   :  { %p377_p8 = scmp.ne.s32.totalorder %s630_s3, %s376_s11  ;;  %p380_p9 = scmp.lt.u32.totalorder %s376_s11, %s630_s3 }
  0x18   :  { %p382_p10 = pnand %p380_p9, %p377_p8 }
  0x1a   :  { %385 = shalt.err (!%p382_p10)
}
  0x1b   :  { %s386_s16 = scalar_lea.vmem %s535_s21, 512  ;;  %p391_p12 = scmp.lt.s32.totalorder %s535_s21, %s535_s21 }
  0x1c   :  { %p387_p11 = scmp.ne.s32.totalorder %s535_s21, %s386_s16  ;;  %p392_p13 = scmp.lt.s32.totalorder %s386_s16, %s386_s16 }
  0x1e   :  { %p393_p0 = por %p392_p13, %p391_p12 }
  0x20   :  { %p394_p1 = pnand %p393_p0, %p387_p11 }
  0x22   :  { %397 = shalt.err (!%p394_p1)
}
  0x23   :  { %59 = dma.hbm_to_vmem [thread:$0]  %s630_s3, 512, %s535_s21, [#allocation9], %s496_s30, %s496_s30, %s497_s6  }
  0x24   :  { %s498_s18 = smov [#allocation2]   ;;  %s499_s20 = smov [#allocation7]  }
  0x25   :  { %s19_s19 = sshll.u32 %s498_s18, 4  ;;  %s44_s22 = sshll.u32 %s499_s20, 4  ;;  %s20_s19 = int_to_ptr.vmem [resolvable:$true] %s19_s19  ;;  %s45_s22 = int_to_ptr.vmem [resolvable:$true] %s44_s22 }
  0x26   :  { %s398_s25 = scalar_lea.hbm %s627_s0, 256 }
  0x27   :  { %p399_p2 = scmp.ne.s32.totalorder %s627_s0, %s398_s25  ;;  %p402_p3 = scmp.lt.u32.totalorder %s398_s25, %s627_s0 }
  0x29   :  { %p404_p4 = pnand %p402_p3, %p399_p2 }
  0x2b   :  { %407 = shalt.err (!%p404_p4)
}
  0x2c   :  { %s408_s3 = scalar_lea.vmem %s20_s19, 256  ;;  %p413_p6 = scmp.lt.s32.totalorder %s20_s19, %s20_s19 }
  0x2d   :  { %p409_p5 = scmp.ne.s32.totalorder %s20_s19, %s408_s3  ;;  %p414_p7 = scmp.lt.s32.totalorder %s408_s3, %s408_s3 }
  0x2f   :  { %p415_p8 = por %p414_p7, %p413_p6 }
  0x31   :  { %p416_p9 = pnand %p415_p8, %p409_p5 }
  0x33   :  { %419 = shalt.err (!%p416_p9)
}
  0x34   :  { %25 = dma.hbm_to_vmem [thread:$0]  %s627_s0, 256, %s20_s19, [#allocation3], %s496_s30, %s496_s30, %s497_s6  }
  0x35   :  { %s420_s10 = scalar_lea.hbm %s629_s2, 16 }
  0x36   :  { %p421_p10 = scmp.ne.s32.totalorder %s629_s2, %s420_s10  ;;  %p424_p11 = scmp.lt.u32.totalorder %s420_s10, %s629_s2 }
  0x38   :  { %p426_p12 = pnand %p424_p11, %p421_p10 }
  0x3a   :  { %429 = shalt.err (!%p426_p12)
}
  0x3b   :  { %s430_s15 = scalar_lea.vmem %s45_s22, 16  ;;  %s434_s16 = scalar_lea.vmem %s45_s22, 32 }
  0x3c   :  { %p431_p13 = scmp.ne.s32.totalorder %s45_s22, %s430_s15  ;;  %p435_p0 = scmp.lt.s32.totalorder %s45_s22, %s45_s22 }
  0x3d   :  { %p436_p1 = scmp.lt.s32.totalorder %s434_s16, %s430_s15 }
  0x3f   :  { %p437_p2 = por %p436_p1, %p435_p0 }
  0x41   :  { %p438_p3 = pnand %p437_p2, %p431_p13 }
  0x43   :  { %441 = shalt.err (!%p438_p3)
}
  0x44   :  { %47 = dma.hbm_to_vmem [thread:$0]  %s629_s2, 16, %s45_s22, [#allocation6]  }
  0x45   :  { %s500_s6 = smov [#allocation10]   ;;  %s442_s19 = scalar_lea.hbm %s631_s4, 16 }
  0x46   :  { %s66_s1 = sshll.u32 %s500_s6, 4  ;;  %p443_p4 = scmp.ne.s32.totalorder %s631_s4, %s442_s19  ;;  %s67_s1 = int_to_ptr.vmem [resolvable:$true] %s66_s1 }
  0x47   :  { %p446_p5 = scmp.lt.u32.totalorder %s442_s19, %s631_s4 }
  0x49   :  { %p448_p6 = pnand %p446_p5, %p443_p4 }
  0x4b   :  { %451 = shalt.err (!%p448_p6)
}
  0x4c   :  { %s452_s26 = scalar_lea.vmem %s67_s1, 16  ;;  %s456_s2 = scalar_lea.vmem %s67_s1, 32 }
  0x4d   :  { %p453_p7 = scmp.ne.s32.totalorder %s67_s1, %s452_s26  ;;  %p457_p8 = scmp.lt.s32.totalorder %s67_s1, %s67_s1 }
  0x4e   :  { %p458_p9 = scmp.lt.s32.totalorder %s456_s2, %s452_s26 }
  0x50   :  { %p459_p10 = por %p458_p9, %p457_p8 }
  0x52   :  { %p460_p11 = pnand %p459_p10, %p453_p7 }
  0x54   :  { %463 = shalt.err (!%p460_p11)
}
  0x55   :  { %69 = dma.hbm_to_vmem [thread:$0]  %s631_s4, 16, %s67_s1, [#allocation9]  }
  0x56   :  { %486 = dma.done.wait [#allocation3], 256  }
  0x57   :  { %487 = vsyncadd [#allocation3], 4294967040 }
  0x58   :  { %488 = dma.done.wait [#allocation6], 528  }
  0x59   :  { %489 = vsyncadd [#allocation6], 4294966768 }
  0x5a   :  { %490 = dma.done.wait [#allocation9], 528  }
  0x5b   :  { %491 = vsyncadd [#allocation9], 4294966768  ;;  %v501_v0 = vmov 0.0|0.0   ;;  %vm502_vm0 = vmmov 0   ;;  %v503_v1 = vmov 0.0   ;;  %vm87_vm1 = vcmask 261120  }
  0x5c   :  { %329 = vmatprep.subr.bf16.mxu0 %v501_v0  ;;  %315 = vmatprep.mubr.msk.f32.mxu0 %vm502_vm0, %v503_v1  ;;  %v102_v2 = vld [vmem:[#allocation5] sm:$0xff]  ;;  %v103_v3 = vld [vmem:[#allocation5 + $0x8] sm:$0xff]  ;;  %v104_v4 = vld [vmem:[#allocation5 + $0x10] sm:$0xff]  ;;  %vm115_vm2 = vcmask 1041409   ;;  %s504_s4 = smov [#allocation11]   ;;  %vm274_vm3 = vcmask 25600  }
  0x5d   :  { %335 = vmatprep.subr.bf16.mxu1 %v501_v0  ;;  %326 = vmatprep.mubr.msk.f32.mxu1 %vm502_vm0, %v503_v1  ;;  %v330_v5 = vpack.c.bf16 %v103_v3, %v102_v2  ;;  %v105_v6 = vld [vmem:[#allocation5 + $0x18] sm:$0xff]  ;;  %v85_v7 = vld [vmem:[#allocation2] sm:$0xff]  ;;  %v190_v25 = vld [vmem:[#allocation8] sm:$0xff]  ;;  %s282_s28 = sshll.u32 %s504_s4, 4  ;;  %s283_s28 = int_to_ptr.vmem [resolvable:$true] %s282_s28 }
  0x5e   :  { %v86_v8 = vld [vmem:[#allocation2 + $0x8] sm:$0xff]  ;;  %v88_v9 = vsel %vm87_vm1, %v85_v7, -inf  ;;  %v333_v11 = vpack.c.bf16 %v105_v6, %v104_v4  ;;  %v191_v26 = vld [vmem:[#allocation8 + $0x8] sm:$0xff]  ;;  %v293_v31 = vld [vmem:[#allocation7] ss:$0 sm:$0xff]  ;;  %s464_s29 = scalar_lea.vmem %s283_s28, 32  ;;  %p469_p13 = scmp.lt.s32.totalorder %s283_s28, %s283_s28 }
  0x5f   :  { %v95_v10 = vsel %vm87_vm1, %v86_v8, -inf  ;;  %331 = vmatpush3.bf16.msra.mxu0 %v330_v5  ;;  %v89_v12 = vrot.slane %v88_v9, 4  ;;  %v192_v27 = vld [vmem:[#allocation8 + $0x10] sm:$0xff]  ;;  %v336_v28 = vpack.c.bf16 %v191_v26, %v190_v25  ;;  %v193_v29 = vld [vmem:[#allocation8 + $0x18] sm:$0xff]  ;;  %v295_v36 = vld [vmem:[#allocation10] ss:$0 sm:$0xff]  ;;  %p465_p12 = scmp.ne.s32.totalorder %s283_s28, %s464_s29  ;;  %p470_p0 = scmp.lt.s32.totalorder %s464_s29, %s464_s29 }
  0x60   :  { %v96_v13 = vrot.slane %v95_v10, 4  ;;  %332 = vmatprep.subr.bf16.mxu0 %v501_v0  ;;  %v339_v30 = vpack.c.bf16 %v193_v29, %v192_v27 }
  0x61   :  { %v90_v14 = vmax.f32 %v88_v9, %v89_v12  ;;  %337 = vmatpush3.bf16.msra.mxu1 %v336_v28  ;;  %p471_p1 = por %p470_p0, %p469_p13 }
  0x62   :  { %v97_v15 = vmax.f32 %v95_v10, %v96_v13  ;;  %338 = vmatprep.subr.bf16.mxu1 %v501_v0 }
  0x63   :  { %334 = vmatpush3.bf16.msra.mxu0 %v333_v11  ;;  %v91_v16 = vrot.slane %v90_v14, 2  ;;  %p472_p2 = pnand %p471_p1, %p465_p12 }
  0x64   :  { %v98_v17 = vrot.slane %v97_v15, 2 }
  0x65   :  { %v92_v18 = vmax.f32 %v90_v14, %v91_v16  ;;  %340 = vmatpush3.bf16.msra.mxu1 %v339_v30 }
  0x66   :  { %v99_v19 = vmax.f32 %v97_v15, %v98_v17 }
  0x67   :  { %v93_v20 = vrot.slane %v92_v18, 1 }
  0x68   :  { %v100_v21 = vrot.slane %v99_v19, 1 }
  0x69   :  { %v94_v22 = vmax.f32 %v92_v18, %v93_v20 }
  0x6a   :  { %v101_v23 = vmax.f32 %v99_v19, %v100_v21 }
  0x6c   :  { %v116_v24 = vsel %vm115_vm2, %v101_v23, %v94_v22 }
  0x6d   :  { %316 = vmatmul.mubr.msk.f32.vlgmr.msra.gmra.mrb[0].mxu0 %vm87_vm1, %v116_v24 }
 0x140   :  { %v185_v32 = vpop.f32.mrb[0].mxu0 }
 0x141   :  { %v186_v33 = vadd.f32 %v293_v31, %v185_v32  ;;  %v317_v34 = vpop.f32.mrb[1].mxu0 }
 0x143   :  { %352 = vtanh.f32 %v186_v33 }
 0x14d   :  { %v353_v35 = vpop.eup %352 }
 0x14e   :  { %327 = vmatmul.mubr.msk.f32.vlgmr.msra.gmra.mrb[0].mxu1 %vm87_vm1, %v353_v35 }
 0x221   :  { %v270_v37 = vpop.f32.mrb[0].mxu1 }
 0x222   :  { %v271_v38 = vadd.f32 %v295_v36, %v270_v37  ;;  %v328_v39 = vpop.f32.mrb[1].mxu1 }
 0x224   :  { %275 = vst.msk [vmem:[#allocation11] sm:$0x3] %vm274_vm3, %v271_v38 }
 0x225   :  { %475 = shalt.err (!%p472_p2)
}
 0x226   :  { %s476_s7 = scalar_lea.hbm %s632_s5, 32 }
 0x227   :  { %p477_p3 = scmp.ne.s32.totalorder %s632_s5, %s476_s7  ;;  %p480_p4 = scmp.lt.u32.totalorder %s476_s7, %s632_s5 }
 0x229   :  { %p482_p5 = pnand %p480_p4, %p477_p3 }
 0x22b   :  { %485 = shalt.err (!%p482_p5)
}
 0x22c   :  { %285 = dma.vmem_to_hbm [thread:$0]  %s283_s28, 32, %s632_s5, [#allocation4]  }
 0x22d   :  { %492 = dma.done.wait [#allocation4], 32  }
 0x22e   :  { %493 = vsyncadd [#allocation4], 4294967264 }
 0x22f   :  { %289 = vsyncpa [#allocation3], 1 }
 0x230   :  { %290 = vsyncpa [#allocation6], 1 }
 0x231   :  { %291 = vsyncpa [#allocation9], 1 }
 0x232   :  { %292 = vsyncpa [#allocation4], 1 }

</bundles_post_ra>
